<compile_context>
chip_gen: v5e
topology: v5e:2x2
jax: 0.10.0
libtpu: 0.0.40
codegen_flags: <defaults>
</compile_context>

<pallas_src>
import functools

import jax
import jax.numpy as jnp
from jax import lax
from jax.experimental import pallas as pl
from jax.experimental.pallas import tpu as pltpu

_LANE = 128
_SUBLANE = 8
_CHUNK_MAX = 64  # max recurrence steps statically unrolled per grid iteration


def _round_up(n, m):
    return ((n + m - 1) // m) * m


def rnn_chunk_kernel(x_ref, w_ih_t_ref, w_hh_t_ref, b_h_ref, w_ho_t_ref, b_o_ref,
                     h0_ref, y_ref, h_out_ref, h_carry_ref, hist_ref,
                     *, chunk, true_len, mask_tail):
    """One sequence chunk per grid step; hidden state carried in VMEM scratch.

    x_ref:       (chunk, I)   input chunk
    w_ih_t_ref:  (I, Hp)      W_ih^T, hidden dim zero-padded to Hp (multiple of 128)
    w_hh_t_ref:  (Hp, Hp)     W_hh^T, zero-padded
    b_h_ref:     (1, Hp)
    w_ho_t_ref:  (Hp, Op)     W_ho.weight^T, zero-padded rows/cols (Op multiple of 128)
    b_o_ref:     (1, Op)
    h0_ref:      (1, Hp)      initial hidden state (zero-padded)
    y_ref:       (chunk, Op)  per-step outputs (lane-dense slab)
    h_out_ref:   (1, Hp)      final hidden state
    h_carry_ref: (1, Hp)      VMEM scratch: hidden state carried across grid steps
    hist_ref:    (chunk, Hp)  VMEM scratch: pre-activations, then overwritten with h_t
    """
    c = pl.program_id(0)

    @pl.when(c == 0)
    def _():
        h_carry_ref[...] = h0_ref[...]

    # Hoisted input projection for the whole chunk: one MXU matmul + one bias add.
    hist_ref[...] = (
        jnp.dot(x_ref[...], w_ih_t_ref[...], preferred_element_type=jnp.float32)
        + b_h_ref[...]
    )

    w_hh_t = w_hh_t_ref[...]
    h = h_carry_ref[...]            # (1, Hp) f32
    chunk_start = c * chunk

    # Serial recurrence, statically unrolled over the chunk (chunk <= _CHUNK_MAX), so
    # only dot(h, W_hh^T) + add + tanh sits on the dependency chain per step.
    # TODO(synk): hold W_hh^T in MXU staging registers (pltpu.matmul_push_rhs) to avoid
    # re-feeding the RHS through the systolic array every step.
    for t in range(chunk):
        pre = hist_ref[pl.ds(t, 1), :] + jnp.dot(
            h, w_hh_t, preferred_element_type=jnp.float32)
        h_new = jnp.tanh(pre)
        if mask_tail:
            # Steps past the true sequence length (tail padding) must not update h.
            h_new = jnp.where(chunk_start + t < true_len, h_new, h)
        hist_ref[pl.ds(t, 1), :] = h_new
        h = h_new

    h_carry_ref[...] = h
    h_out_ref[...] = h

    # Deferred, lane-dense output projection: one (chunk,Hp)@(Hp,Op) matmul + bias,
    # stored as a full slab (Op is a multiple of 128 -> unmasked stores).
    y_ref[...] = (
        jnp.dot(hist_ref[...], w_ho_t_ref[...], preferred_element_type=jnp.float32)
        + b_o_ref[...]
    ).astype(y_ref.dtype)


def prepare_rnn_params(W_ih, W_hh, b_h, W_ho_w, W_ho_b):
    """One-time layout work (transpose + zero-pad hidden/output dims to multiples of
    128), hoisted out of the per-call hot path."""
    hidden_size, input_size = W_ih.shape
    output_size = W_ho_w.shape[0]
    Hp = _round_up(hidden_size, _LANE)
    Op = _round_up(output_size, _LANE)
    f32 = jnp.float32

    w_ih_t = jnp.zeros((input_size, Hp), f32).at[:, :hidden_size].set(W_ih.T.astype(f32))
    w_hh_t = jnp.zeros((Hp, Hp), f32).at[:hidden_size, :hidden_size].set(W_hh.T.astype(f32))
    b_h_p = jnp.zeros((1, Hp), f32).at[0, :hidden_size].set(b_h.astype(f32))
    w_ho_t = jnp.zeros((Hp, Op), f32).at[:hidden_size, :output_size].set(W_ho_w.T.astype(f32))
    b_o_p = jnp.zeros((1, Op), f32).at[0, :output_size].set(W_ho_b.astype(f32))

    return dict(w_ih_t=w_ih_t, w_hh_t=w_hh_t, b_h=b_h_p, w_ho_t=w_ho_t, b_o=b_o_p,
                input_size=input_size, hidden_size=hidden_size,
                output_size=output_size, Hp=Hp, Op=Op)


def vanilla_rnn_forward(x_seq, params, h0=None):
    """Hot path: pad x/h0 (cheap, per-call data), run one gridded Pallas call."""
    seq_len, input_size = x_seq.shape
    assert input_size == params["input_size"]
    hidden_size = params["hidden_size"]
    output_size = params["output_size"]
    Hp, Op = params["Hp"], params["Op"]
    f32 = jnp.float32

    # Sequence-chunk grid: bounds the in-kernel unroll and caps VMEM at chunk size.
    if seq_len <= _CHUNK_MAX:
        chunk = max(_SUBLANE, _round_up(seq_len, _SUBLANE))
    else:
        chunk = _CHUNK_MAX
    num_chunks = pl.cdiv(seq_len, chunk)
    padded_len = num_chunks * chunk
    mask_tail = padded_len != seq_len

    x = x_seq.astype(f32)
    if padded_len != seq_len:
        x = jnp.zeros((padded_len, input_size), f32).at[:seq_len].set(x)

    if h0 is None:
        h0_p = jnp.zeros((1, Hp), f32)
    else:
        h0_p = jnp.zeros((1, Hp), f32).at[0, :hidden_size].set(h0.astype(f32))

    kernel = functools.partial(rnn_chunk_kernel, chunk=chunk, true_len=seq_len,
                               mask_tail=mask_tail)

    # Advisory cost estimate so XLA can schedule around the custom call.
    flops = 2 * padded_len * (input_size * Hp + Hp * Hp + Hp * Op)
    bytes_accessed = 4 * (padded_len * input_size + input_size * Hp + Hp * Hp + Hp
                          + Hp * Op + Op + Hp + padded_len * Op + Hp)
    cost = pl.CostEstimate(flops=int(flops),
                           transcendentals=int(padded_len * Hp),
                           bytes_accessed=int(bytes_accessed))

    # VMEM budget: double-buffered blocks + scratch, with headroom; capped well under
    # the smallest physical VMEM (v7x: 64 MiB).
    block_bytes = 4 * (2 * chunk * input_size + 2 * input_size * Hp + 2 * Hp * Hp
                       + 2 * Hp + 2 * Hp * Op + 2 * Op + 2 * Hp
                       + 2 * chunk * Op + 2 * Hp + chunk * Hp + Hp)
    vmem_limit = int(min(max(4 * block_bytes, 4 << 20), 48 << 20))

    grid_spec = pltpu.PrefetchScalarGridSpec(
        num_scalar_prefetch=0,
        grid=(num_chunks,),
        in_specs=[
            pl.BlockSpec((chunk, input_size), lambda c: (c, 0)),   # x chunk
            pl.BlockSpec((input_size, Hp), lambda c: (0, 0)),      # W_ih^T
            pl.BlockSpec((Hp, Hp), lambda c: (0, 0)),              # W_hh^T
            pl.BlockSpec((1, Hp), lambda c: (0, 0)),               # b_h
            pl.BlockSpec((Hp, Op), lambda c: (0, 0)),              # W_ho^T
            pl.BlockSpec((1, Op), lambda c: (0, 0)),               # b_o
            pl.BlockSpec((1, Hp), lambda c: (0, 0)),               # h0
        ],
        out_specs=(
            pl.BlockSpec((chunk, Op), lambda c: (c, 0)),           # y chunk
            pl.BlockSpec((1, Hp), lambda c: (0, 0)),               # final hidden
        ),
        scratch_shapes=[
            pltpu.VMEM((1, Hp), f32),        # hidden-state carry across grid steps
            pltpu.VMEM((chunk, Hp), f32),    # pre-activations / h_t history
        ],
    )

    y_pad, h_final_p = pl.pallas_call(
        kernel,
        grid_spec=grid_spec,
        out_shape=(
            jax.ShapeDtypeStruct((padded_len, Op), f32),
            jax.ShapeDtypeStruct((1, Hp), f32),
        ),
        compiler_params=pltpu.CompilerParams(
            dimension_semantics=("arbitrary",),   # serial recurrence across chunks
            vmem_limit_bytes=vmem_limit,
        ),
        cost_estimate=cost,
    )(x, params["w_ih_t"], params["w_hh_t"], params["b_h"],
      params["w_ho_t"], params["b_o"], h0_p)

    return y_pad[:seq_len, :output_size], h_final_p[0, :hidden_size]


def reference_forward(x_seq, W_ih, W_hh, b_h, W_ho_w, W_ho_b):
    """Pure-JAX reference mirroring the PyTorch forward."""
    hidden_size = W_hh.shape[0]

    def step(h, x_t):
        h_new = jnp.tanh(W_ih @ x_t + W_hh @ h + b_h)
        y_t = W_ho_w @ h_new + W_ho_b
        return h_new, y_t

    h0 = jnp.zeros((hidden_size,), jnp.float32)
    h_final, ys = lax.scan(step, h0, x_seq)
    return ys, h_final


if __name__ == "__main__":
    seq_len, input_size, hidden_size, output_size = 8, 16, 32, 8

    key = jax.random.PRNGKey(0)
    k_x, k_wih, k_whh, k_who, k_bho = jax.random.split(key, 5)

    x_seq = jax.random.normal(k_x, (seq_len, input_size), dtype=jnp.float32)
    W_ih = jax.random.normal(k_wih, (hidden_size, input_size), dtype=jnp.float32)
    W_hh = jax.random.normal(k_whh, (hidden_size, hidden_size), dtype=jnp.float32)
    b_h = jnp.zeros((hidden_size,), dtype=jnp.float32)
    W_ho_w = jax.random.normal(k_who, (output_size, hidden_size), dtype=jnp.float32) * 0.1
    W_ho_b = jax.random.normal(k_bho, (output_size,), dtype=jnp.float32) * 0.1

    params = prepare_rnn_params(W_ih, W_hh, b_h, W_ho_w, W_ho_b)   # one-time layout

    y_seq, h_final = vanilla_rnn_forward(x_seq, params)
    jax.block_until_ready((y_seq, h_final))

    y_ref, h_ref = reference_forward(x_seq, W_ih, W_hh, b_h, W_ho_w, W_ho_b)
    assert y_seq.shape == (seq_len, output_size)
    assert h_final.shape == (hidden_size,)
    assert jnp.allclose(y_seq, y_ref, atol=1e-4, rtol=1e-4)
    assert jnp.allclose(h_final, h_ref, atol=1e-4, rtol=1e-4)

    print("KERNEL_OK")
</pallas_src>

<mosaic_0001>
module attributes {stable_mosaic.version = 11 : i64} {
  func.func @rnn_chunk_kernel(%arg0: i32, %arg1: memref<8x16xf32, #tpu.memory_space<vmem>>, %arg2: memref<16x128xf32, #tpu.memory_space<vmem>>, %arg3: memref<128x128xf32, #tpu.memory_space<vmem>>, %arg4: memref<1x128xf32, #tpu.memory_space<vmem>>, %arg5: memref<128x128xf32, #tpu.memory_space<vmem>>, %arg6: memref<1x128xf32, #tpu.memory_space<vmem>>, %arg7: memref<1x128xf32, #tpu.memory_space<vmem>>, %arg8: memref<8x128xf32, #tpu.memory_space<vmem>>, %arg9: memref<1x128xf32, #tpu.memory_space<vmem>>, %arg10: memref<1x128xf32, #tpu.memory_space<vmem>>, %arg11: memref<8x128xf32, #tpu.memory_space<vmem>>) attributes {dimension_semantics = [#tpu.dimension_semantics<arbitrary>], iteration_bounds = array<i64: 1>, scalar_prefetch = 0 : i64, scratch_operands = 2 : i64, tpu.core_type = #tpu.core_type<tc>, window_params = [{transform_indices = @transform_0, window_bounds = array<i64: 8, 16>}, {pipeline_mode = #tpu.pipeline_mode<synchronous>, transform_indices = @transform_1, window_bounds = array<i64: 16, 128>}, {pipeline_mode = #tpu.pipeline_mode<synchronous>, transform_indices = @transform_2, window_bounds = array<i64: 128, 128>}, {pipeline_mode = #tpu.pipeline_mode<synchronous>, transform_indices = @transform_3, window_bounds = array<i64: 1, 128>}, {pipeline_mode = #tpu.pipeline_mode<synchronous>, transform_indices = @transform_4, window_bounds = array<i64: 128, 128>}, {pipeline_mode = #tpu.pipeline_mode<synchronous>, transform_indices = @transform_5, window_bounds = array<i64: 1, 128>}, {pipeline_mode = #tpu.pipeline_mode<synchronous>, transform_indices = @transform_6, window_bounds = array<i64: 1, 128>}, {transform_indices = @transform_7, window_bounds = array<i64: 8, 128>}, {pipeline_mode = #tpu.pipeline_mode<synchronous>, transform_indices = @transform_8, window_bounds = array<i64: 1, 128>}]} {
    %c0_i32 = arith.constant 0 : i32
    %0 = arith.cmpi eq, %arg0, %c0_i32 : i32
    %1 = arith.extui %0 : i1 to i32
    %c0_i32_0 = arith.constant 0 : i32
    %2 = arith.cmpi ne, %1, %c0_i32_0 : i32
    scf.if %2 {
      %c0_58 = arith.constant 0 : index
      %c0_59 = arith.constant 0 : index
      %61 = vector.load %arg7[%c0_58, %c0_59] : memref<1x128xf32, #tpu.memory_space<vmem>>, vector<1x128xf32>
      %c0_60 = arith.constant 0 : index
      %c0_61 = arith.constant 0 : index
      %62 = vector.load %arg10[%c0_60, %c0_61] : memref<1x128xf32, #tpu.memory_space<vmem>>, vector<1x128xf32>
      tpu.vector_store %arg10[%c0_60, %c0_61], %61 {strides = array<i32>} : memref<1x128xf32, #tpu.memory_space<vmem>>, vector<1x128xf32>,
    } else {
    }
    %c0 = arith.constant 0 : index
    %c0_1 = arith.constant 0 : index
    %3 = vector.load %arg1[%c0, %c0_1] : memref<8x16xf32, #tpu.memory_space<vmem>>, vector<8x16xf32>
    %c0_2 = arith.constant 0 : index
    %c0_3 = arith.constant 0 : index
    %4 = vector.load %arg2[%c0_2, %c0_3] : memref<16x128xf32, #tpu.memory_space<vmem>>, vector<16x128xf32>
    %cst = arith.constant dense<0.000000e+00> : vector<8x128xf32>
    %5 = tpu.matmul %3, %4, %cst {dimension_numbers = #tpu.dot_dimension_numbers<[1], [0], [0], [1], [0, 0, 1, 1], [], []>} : vector<8x16xf32>, vector<16x128xf32>, vector<8x128xf32> -> vector<8x128xf32>
    %c0_4 = arith.constant 0 : index
    %c0_5 = arith.constant 0 : index
    %6 = vector.load %arg4[%c0_4, %c0_5] : memref<1x128xf32, #tpu.memory_space<vmem>>, vector<1x128xf32>
    %7 = vector.broadcast %6 : vector<1x128xf32> to vector<8x128xf32>
    %8 = arith.addf %5, %7 : vector<8x128xf32>
    %c0_6 = arith.constant 0 : index
    %c0_7 = arith.constant 0 : index
    %9 = vector.load %arg11[%c0_6, %c0_7] : memref<8x128xf32, #tpu.memory_space<vmem>>, vector<8x128xf32>
    tpu.vector_store %arg11[%c0_6, %c0_7], %8 {strides = array<i32>} : memref<8x128xf32, #tpu.memory_space<vmem>>, vector<8x128xf32>,
    %c0_8 = arith.constant 0 : index
    %c0_9 = arith.constant 0 : index
    %10 = vector.load %arg3[%c0_8, %c0_9] : memref<128x128xf32, #tpu.memory_space<vmem>>, vector<128x128xf32>
    %c0_10 = arith.constant 0 : index
    %c0_11 = arith.constant 0 : index
    %11 = vector.load %arg10[%c0_10, %c0_11] : memref<1x128xf32, #tpu.memory_space<vmem>>, vector<1x128xf32>
    %c0_12 = arith.constant 0 : index
    %c0_13 = arith.constant 0 : index
    %12 = vector.load %arg11[%c0_12, %c0_13] : memref<8x128xf32, #tpu.memory_space<vmem>>, vector<1x128xf32>
    %cst_14 = arith.constant dense<0.000000e+00> : vector<1x128xf32>
    %13 = tpu.matmul %11, %10, %cst_14 {dimension_numbers = #tpu.dot_dimension_numbers<[1], [0], [0], [1], [0, 0, 1, 1], [], []>} : vector<1x128xf32>, vector<128x128xf32>, vector<1x128xf32> -> vector<1x128xf32>
    %14 = arith.addf %12, %13 : vector<1x128xf32>
    %15 = math.tanh %14 : vector<1x128xf32>
    %c0_15 = arith.constant 0 : index
    %c0_16 = arith.constant 0 : index
    %16 = vector.load %arg11[%c0_15, %c0_16] : memref<8x128xf32, #tpu.memory_space<vmem>>, vector<1x128xf32>
    tpu.vector_store %arg11[%c0_15, %c0_16], %15 {strides = array<i32>} : memref<8x128xf32, #tpu.memory_space<vmem>>, vector<1x128xf32>,
    %c1 = arith.constant 1 : index
    %c0_17 = arith.constant 0 : index
    %17 = vector.load %arg11[%c1, %c0_17] : memref<8x128xf32, #tpu.memory_space<vmem>>, vector<1x128xf32>
    %cst_18 = arith.constant dense<0.000000e+00> : vector<1x128xf32>
    %18 = tpu.matmul %15, %10, %cst_18 {dimension_numbers = #tpu.dot_dimension_numbers<[1], [0], [0], [1], [0, 0, 1, 1], [], []>} : vector<1x128xf32>, vector<128x128xf32>, vector<1x128xf32> -> vector<1x128xf32>
    %19 = arith.addf %17, %18 : vector<1x128xf32>
    %20 = math.tanh %19 : vector<1x128xf32>
    %c1_19 = arith.constant 1 : index
    %c0_20 = arith.constant 0 : index
    %21 = vector.load %arg11[%c1_19, %c0_20] : memref<8x128xf32, #tpu.memory_space<vmem>>, vector<1x128xf32>
    tpu.vector_store %arg11[%c1_19, %c0_20], %20 {strides = array<i32>} : memref<8x128xf32, #tpu.memory_space<vmem>>, vector<1x128xf32>,
    %c2 = arith.constant 2 : index
    %c0_21 = arith.constant 0 : index
    %22 = vector.load %arg11[%c2, %c0_21] : memref<8x128xf32, #tpu.memory_space<vmem>>, vector<1x128xf32>
    %cst_22 = arith.constant dense<0.000000e+00> : vector<1x128xf32>
    %23 = tpu.matmul %20, %10, %cst_22 {dimension_numbers = #tpu.dot_dimension_numbers<[1], [0], [0], [1], [0, 0, 1, 1], [], []>} : vector<1x128xf32>, vector<128x128xf32>, vector<1x128xf32> -> vector<1x128xf32>
    %24 = arith.addf %22, %23 : vector<1x128xf32>
    %25 = math.tanh %24 : vector<1x128xf32>
    %c2_23 = arith.constant 2 : index
    %c0_24 = arith.constant 0 : index
    %26 = vector.load %arg11[%c2_23, %c0_24] : memref<8x128xf32, #tpu.memory_space<vmem>>, vector<1x128xf32>
    tpu.vector_store %arg11[%c2_23, %c0_24], %25 {strides = array<i32>} : memref<8x128xf32, #tpu.memory_space<vmem>>, vector<1x128xf32>,
    %c3 = arith.constant 3 : index
    %c0_25 = arith.constant 0 : index
    %27 = vector.load %arg11[%c3, %c0_25] : memref<8x128xf32, #tpu.memory_space<vmem>>, vector<1x128xf32>
    %cst_26 = arith.constant dense<0.000000e+00> : vector<1x128xf32>
    %28 = tpu.matmul %25, %10, %cst_26 {dimension_numbers = #tpu.dot_dimension_numbers<[1], [0], [0], [1], [0, 0, 1, 1], [], []>} : vector<1x128xf32>, vector<128x128xf32>, vector<1x128xf32> -> vector<1x128xf32>
    %29 = arith.addf %27, %28 : vector<1x128xf32>
    %30 = math.tanh %29 : vector<1x128xf32>
    %c3_27 = arith.constant 3 : index
    %c0_28 = arith.constant 0 : index
    %31 = vector.load %arg11[%c3_27, %c0_28] : memref<8x128xf32, #tpu.memory_space<vmem>>, vector<1x128xf32>
    tpu.vector_store %arg11[%c3_27, %c0_28], %30 {strides = array<i32>} : memref<8x128xf32, #tpu.memory_space<vmem>>, vector<1x128xf32>,
    %c4 = arith.constant 4 : index
    %c0_29 = arith.constant 0 : index
    %32 = vector.load %arg11[%c4, %c0_29] : memref<8x128xf32, #tpu.memory_space<vmem>>, vector<1x128xf32>
    %cst_30 = arith.constant dense<0.000000e+00> : vector<1x128xf32>
    %33 = tpu.matmul %30, %10, %cst_30 {dimension_numbers = #tpu.dot_dimension_numbers<[1], [0], [0], [1], [0, 0, 1, 1], [], []>} : vector<1x128xf32>, vector<128x128xf32>, vector<1x128xf32> -> vector<1x128xf32>
    %34 = arith.addf %32, %33 : vector<1x128xf32>
    %35 = math.tanh %34 : vector<1x128xf32>
    %c4_31 = arith.constant 4 : index
    %c0_32 = arith.constant 0 : index
    %36 = vector.load %arg11[%c4_31, %c0_32] : memref<8x128xf32, #tpu.memory_space<vmem>>, vector<1x128xf32>
    tpu.vector_store %arg11[%c4_31, %c0_32], %35 {strides = array<i32>} : memref<8x128xf32, #tpu.memory_space<vmem>>, vector<1x128xf32>,
    %c5 = arith.constant 5 : index
    %c0_33 = arith.constant 0 : index
    %37 = vector.load %arg11[%c5, %c0_33] : memref<8x128xf32, #tpu.memory_space<vmem>>, vector<1x128xf32>
    %cst_34 = arith.constant dense<0.000000e+00> : vector<1x128xf32>
    %38 = tpu.matmul %35, %10, %cst_34 {dimension_numbers = #tpu.dot_dimension_numbers<[1], [0], [0], [1], [0, 0, 1, 1], [], []>} : vector<1x128xf32>, vector<128x128xf32>, vector<1x128xf32> -> vector<1x128xf32>
    %39 = arith.addf %37, %38 : vector<1x128xf32>
    %40 = math.tanh %39 : vector<1x128xf32>
    %c5_35 = arith.constant 5 : index
    %c0_36 = arith.constant 0 : index
    %41 = vector.load %arg11[%c5_35, %c0_36] : memref<8x128xf32, #tpu.memory_space<vmem>>, vector<1x128xf32>
    tpu.vector_store %arg11[%c5_35, %c0_36], %40 {strides = array<i32>} : memref<8x128xf32, #tpu.memory_space<vmem>>, vector<1x128xf32>,
    %c6 = arith.constant 6 : index
    %c0_37 = arith.constant 0 : index
    %42 = vector.load %arg11[%c6, %c0_37] : memref<8x128xf32, #tpu.memory_space<vmem>>, vector<1x128xf32>
    %cst_38 = arith.constant dense<0.000000e+00> : vector<1x128xf32>
    %43 = tpu.matmul %40, %10, %cst_38 {dimension_numbers = #tpu.dot_dimension_numbers<[1], [0], [0], [1], [0, 0, 1, 1], [], []>} : vector<1x128xf32>, vector<128x128xf32>, vector<1x128xf32> -> vector<1x128xf32>
    %44 = arith.addf %42, %43 : vector<1x128xf32>
    %45 = math.tanh %44 : vector<1x128xf32>
    %c6_39 = arith.constant 6 : index
    %c0_40 = arith.constant 0 : index
    %46 = vector.load %arg11[%c6_39, %c0_40] : memref<8x128xf32, #tpu.memory_space<vmem>>, vector<1x128xf32>
    tpu.vector_store %arg11[%c6_39, %c0_40], %45 {strides = array<i32>} : memref<8x128xf32, #tpu.memory_space<vmem>>, vector<1x128xf32>,
    %c7 = arith.constant 7 : index
    %c0_41 = arith.constant 0 : index
    %47 = vector.load %arg11[%c7, %c0_41] : memref<8x128xf32, #tpu.memory_space<vmem>>, vector<1x128xf32>
    %cst_42 = arith.constant dense<0.000000e+00> : vector<1x128xf32>
    %48 = tpu.matmul %45, %10, %cst_42 {dimension_numbers = #tpu.dot_dimension_numbers<[1], [0], [0], [1], [0, 0, 1, 1], [], []>} : vector<1x128xf32>, vector<128x128xf32>, vector<1x128xf32> -> vector<1x128xf32>
    %49 = arith.addf %47, %48 : vector<1x128xf32>
    %50 = math.tanh %49 : vector<1x128xf32>
    %c7_43 = arith.constant 7 : index
    %c0_44 = arith.constant 0 : index
    %51 = vector.load %arg11[%c7_43, %c0_44] : memref<8x128xf32, #tpu.memory_space<vmem>>, vector<1x128xf32>
    tpu.vector_store %arg11[%c7_43, %c0_44], %50 {strides = array<i32>} : memref<8x128xf32, #tpu.memory_space<vmem>>, vector<1x128xf32>,
    %c0_45 = arith.constant 0 : index
    %c0_46 = arith.constant 0 : index
    %52 = vector.load %arg10[%c0_45, %c0_46] : memref<1x128xf32, #tpu.memory_space<vmem>>, vector<1x128xf32>
    tpu.vector_store %arg10[%c0_45, %c0_46], %50 {strides = array<i32>} : memref<1x128xf32, #tpu.memory_space<vmem>>, vector<1x128xf32>,
    %c0_47 = arith.constant 0 : index
    %c0_48 = arith.constant 0 : index
    %53 = vector.load %arg9[%c0_47, %c0_48] : memref<1x128xf32, #tpu.memory_space<vmem>>, vector<1x128xf32>
    tpu.vector_store %arg9[%c0_47, %c0_48], %50 {strides = array<i32>} : memref<1x128xf32, #tpu.memory_space<vmem>>, vector<1x128xf32>,
    %c0_49 = arith.constant 0 : index
    %c0_50 = arith.constant 0 : index
    %54 = vector.load %arg11[%c0_49, %c0_50] : memref<8x128xf32, #tpu.memory_space<vmem>>, vector<8x128xf32>
    %c0_51 = arith.constant 0 : index
    %c0_52 = arith.constant 0 : index
    %55 = vector.load %arg5[%c0_51, %c0_52] : memref<128x128xf32, #tpu.memory_space<vmem>>, vector<128x128xf32>
    %cst_53 = arith.constant dense<0.000000e+00> : vector<8x128xf32>
    %56 = tpu.matmul %54, %55, %cst_53 {dimension_numbers = #tpu.dot_dimension_numbers<[1], [0], [0], [1], [0, 0, 1, 1], [], []>} : vector<8x128xf32>, vector<128x128xf32>, vector<8x128xf32> -> vector<8x128xf32>
    %c0_54 = arith.constant 0 : index
    %c0_55 = arith.constant 0 : index
    %57 = vector.load %arg6[%c0_54, %c0_55] : memref<1x128xf32, #tpu.memory_space<vmem>>, vector<1x128xf32>
    %58 = vector.broadcast %57 : vector<1x128xf32> to vector<8x128xf32>
    %59 = arith.addf %56, %58 : vector<8x128xf32>
    %c0_56 = arith.constant 0 : index
    %c0_57 = arith.constant 0 : index
    %60 = vector.load %arg8[%c0_56, %c0_57] : memref<8x128xf32, #tpu.memory_space<vmem>>, vector<8x128xf32>
    tpu.vector_store %arg8[%c0_56, %c0_57], %59 {strides = array<i32>} : memref<8x128xf32, #tpu.memory_space<vmem>>, vector<8x128xf32>,
    return
  }
  func.func @transform_0(%arg0: i32) -> (i32, i32) {
    %c0_i32 = arith.constant 0 : i32
    %c0_i32_0 = arith.constant 0 : i32
    return %arg0, %c0_i32 : i32, i32
  }
  func.func @transform_1(%arg0: i32) -> (i32, i32) {
    %c0_i32 = arith.constant 0 : i32
    %c0_i32_0 = arith.constant 0 : i32
    %c0_i32_1 = arith.constant 0 : i32
    return %c0_i32, %c0_i32_0 : i32, i32
  }
  func.func @transform_2(%arg0: i32) -> (i32, i32) {
    %c0_i32 = arith.constant 0 : i32
    %c0_i32_0 = arith.constant 0 : i32
    %c0_i32_1 = arith.constant 0 : i32
    return %c0_i32, %c0_i32_0 : i32, i32
  }
  func.func @transform_3(%arg0: i32) -> (i32, i32) {
    %c0_i32 = arith.constant 0 : i32
    %c0_i32_0 = arith.constant 0 : i32
    %c0_i32_1 = arith.constant 0 : i32
    return %c0_i32, %c0_i32_0 : i32, i32
  }
  func.func @transform_4(%arg0: i32) -> (i32, i32) {
    %c0_i32 = arith.constant 0 : i32
    %c0_i32_0 = arith.constant 0 : i32
    %c0_i32_1 = arith.constant 0 : i32
    return %c0_i32, %c0_i32_0 : i32, i32
  }
  func.func @transform_5(%arg0: i32) -> (i32, i32) {
    %c0_i32 = arith.constant 0 : i32
    %c0_i32_0 = arith.constant 0 : i32
    %c0_i32_1 = arith.constant 0 : i32
    return %c0_i32, %c0_i32_0 : i32, i32
  }
  func.func @transform_6(%arg0: i32) -> (i32, i32) {
    %c0_i32 = arith.constant 0 : i32
    %c0_i32_0 = arith.constant 0 : i32
    %c0_i32_1 = arith.constant 0 : i32
    return %c0_i32, %c0_i32_0 : i32, i32
  }
  func.func @transform_7(%arg0: i32) -> (i32, i32) {
    %c0_i32 = arith.constant 0 : i32
    %c0_i32_0 = arith.constant 0 : i32
    return %arg0, %c0_i32 : i32, i32
  }
  func.func @transform_8(%arg0: i32) -> (i32, i32) {
    %c0_i32 = arith.constant 0 : i32
    %c0_i32_0 = arith.constant 0 : i32
    %c0_i32_1 = arith.constant 0 : i32
    return %c0_i32, %c0_i32_0 : i32, i32
  }
}

</mosaic_0001>

<bundles_post_ra>
// kernel: tpu_custom_call.1
= control target key start
LH: loop header
LB: loop body
LE: loop exit
PB: predicated region body
PF: predicated region fallthrough
CT: control target
= control target key end

     0   :  { %14 = vsyncpa [#allocation5], 0  ;;  %s838_s0 = inlined_call_operand.hbm [shape: f32[8,16], index: 0, kind: input, shape index: {}]   ;;  %s839_s1 = inlined_call_operand.hbm [shape: f32[16,128], index: 1, kind: input, shape index: {}]   ;;  %s840_s2 = inlined_call_operand.hbm [shape: f32[128,128], index: 2, kind: input, shape index: {}]   ;;  %s841_s3 = inlined_call_operand.vmem [shape: f32[1,128], index: 3, kind: input, shape index: {}]   ;;  %s842_s4 = inlined_call_operand.hbm [shape: f32[128,128], index: 4, kind: input, shape index: {}]   ;;  %s843_s5 = inlined_call_operand.vmem [shape: f32[1,128], index: 5, kind: input, shape index: {}]   ;;  %s844_s6 = inlined_call_operand.vmem [shape: f32[1,128], index: 6, kind: input, shape index: {}]   ;;  %s845_s7 = inlined_call_operand.hbm [shape: f32[8,128], index: 7, kind: output, shape index: {0}]   ;;  %s846_s8 = inlined_call_operand.hbm [shape: f32[1,128], index: 8, kind: output, shape index: {1}]  }
   0x1   :  { %15 = vsyncpa [#allocation8], 0 }
   0x2   :  { %16 = vsyncpa [#allocation11], 0 }
   0x3   :  { %17 = vsyncpa [#allocation6], 0  ;;  %s34_s29 = sshll.u32 %s839_s1, 4  ;;  %s35_s29 = int_to_ptr.hbm [resolvable:$true] %s34_s29 }
   0x4   :  { %18 = vsyncpa [#allocation14], 0  ;;  %s598_s30 = smov [#allocation7]   ;;  %s24_s12 = sshll.u32 %s838_s0, 4  ;;  %s25_s12 = int_to_ptr.hbm [resolvable:$true] %s24_s12 }
   0x5   :  { %s36_s9 = sshll.u32 %s598_s30, 4  ;;  %s599_s13 = smov 128   ;;  %s37_s9 = int_to_ptr.vmem [resolvable:$true] %s36_s9 }
   0x6   :  { %s600_s14 = smov 8   ;;  %s601_s15 = smov [#allocation4]  }
   0x7   :  { %42 = dma.hbm_to_vmem [thread:$0]  %s35_s29, 256, %s37_s9, [#allocation8], %s599_s13, %s599_s13, %s600_s14  }
   0x8   :  { %s26_s16 = sshll.u32 %s601_s15, 4  ;;  %s47_s19 = sshll.u32 %s840_s2, 4  ;;  %s27_s16 = int_to_ptr.vmem [resolvable:$true] %s26_s16  ;;  %s48_s19 = int_to_ptr.hbm [resolvable:$true] %s47_s19 }
   0x9   :  { %29 = dma.hbm_to_vmem [thread:$0]  %s25_s12, 128, %s27_s16, [#allocation5]  }
   0xa   :  { %s62_s21 = sshll.u32 %s842_s4, 4  ;;  %s602_s22 = smov [#allocation9]   ;;  %s63_s21 = int_to_ptr.hbm [resolvable:$true] %s62_s21 }
   0xb   :  { %s49_s23 = sshll.u32 %s602_s22, 4  ;;  %s603_s0 = smov [#allocation10]   ;;  %s50_s23 = int_to_ptr.vmem [resolvable:$true] %s49_s23 }
   0xc   :  { %55 = dma.hbm_to_vmem [thread:$0]  %s48_s19, 2048, %s50_s23, [#allocation8], %s599_s13, %s599_s13, %s600_s14  }
   0xd   :  { %s64_s24 = sshll.u32 %s603_s0, 4  ;;  %s65_s24 = int_to_ptr.vmem [resolvable:$true] %s64_s24 }
   0xe   :  { %70 = dma.hbm_to_vmem [thread:$0]  %s63_s21, 2048, %s65_s24, [#allocation11], %s599_s13, %s599_s13, %s600_s14  }
   0xf   :  { %588 = dma.done.wait [#allocation5], 128  }
  0x10   :  { %589 = vsyncadd [#allocation5], 4294967168 }
  0x11   :  { %590 = dma.done.wait [#allocation8], 2304  }
  0x12   :  { %591 = vsyncadd [#allocation8], 4294964992 }
  0x13   :  { %592 = dma.done.wait [#allocation11], 2048  }
  0x14   :  { %593 = vsyncadd [#allocation11], 4294965248  ;;  %v663_v0 = vld [vmem:[#allocation9 + $0x78] sm:$0xff]  ;;  %v665_v1 = vld [vmem:[#allocation9 + $0x70] sm:$0xff]  ;;  %vm104_vm0 = vcmask 130048   ;;  %s400_s29 = sshll.u32 %s846_s8, 4  ;;  %s401_s29 = int_to_ptr.hbm [resolvable:$true] %s400_s29 }
  0x15   :  { %147 = vmatpush.msra.mxu1 %v663_v0  ;;  %171 = vmatpush.msra.mxu2 %v663_v0  ;;  %v669_v2 = vld [vmem:[#allocation9 + $0x68] sm:$0xff]  ;;  %v99_v3 = vld [vmem:[#allocation7 + $0x8] sm:$0xff]  ;;  %v98_v4 = vld [vmem:[#allocation7] sm:$0xff]  ;;  %s605_s10 = smov [#allocation12]   ;;  %s389_s14 = sshll.u32 %s845_s7, 4  ;;  %s390_s14 = int_to_ptr.hbm [resolvable:$true] %s389_s14 }
  0x16   :  { %195 = vmatpush.msra.mxu3 %v663_v0  ;;  %v674_v5 = vld [vmem:[#allocation9 + $0x60] sm:$0xff]  ;;  %122 = vmatpush.msra.mxu0 %v99_v3  ;;  %v97_v6 = vld [vmem:[#allocation4] sm:$0xff]  ;;  %v679_v7 = vld [vmem:[#allocation9 + $0x58] sm:$0xff]  ;;  %s387_s11 = sshll.u32 %s605_s10, 4  ;;  %s388_s11 = int_to_ptr.vmem [resolvable:$true] %s387_s11 }
  0x17   :  { %148 = vmatpush.msra.mxu1 %v665_v1  ;;  %172 = vmatpush.msra.mxu2 %v665_v1  ;;  %v95_v8 = vld [vmem:[%s844_s6] sm:$0x1]  ;;  %v686_v9 = vld [vmem:[#allocation9 + $0x50] sm:$0xff]  ;;  %v692_v10 = vld [vmem:[#allocation9 + $0x48] sm:$0xff] }
  0x18   :  { %196 = vmatpush.msra.mxu3 %v665_v1  ;;  %123 = vmatpush.msra.mxu0 %v98_v4  ;;  %96 = vst [vmem:[#allocation2] sm:$0x1] %v95_v8  ;;  %v698_v11 = vld [vmem:[#allocation9 + $0x40] sm:$0xff]  ;;  %v704_v12 = vld [vmem:[#allocation9 + $0x38] sm:$0xff]  ;;  %v710_v13 = vld [vmem:[#allocation9 + $0x30] sm:$0xff] }
  0x19   :  { %149 = vmatpush.msra.mxu1 %v669_v2  ;;  %173 = vmatpush.msra.mxu2 %v669_v2  ;;  %v716_v14 = vld [vmem:[#allocation9 + $0x28] sm:$0xff]  ;;  %v722_v15 = vld [vmem:[#allocation9 + $0x20] sm:$0xff]  ;;  %v728_v16 = vld [vmem:[#allocation9 + $0x18] sm:$0xff] }
  0x1a   :  { %197 = vmatpush.msra.mxu3 %v669_v2  ;;  %417 = vmatmul.msk.f32.vlgmr.msra.gmra.mxu0 %vm104_vm0, %v97_v6  ;;  %v734_v17 = vld [vmem:[#allocation9 + $0x10] sm:$0xff]  ;;  %v740_v18 = vld [vmem:[#allocation9 + $0x8] sm:$0xff]  ;;  %v746_v19 = vld [vmem:[#allocation9] sm:$0xff] }
  0x1b   :  { %150 = vmatpush.msra.mxu1 %v674_v5  ;;  %174 = vmatpush.msra.mxu2 %v674_v5  ;;  %v426_v21 = vld [vmem:[%s841_s3] ss:$0 sm:$0xff]  ;;  %v355_v49 = vld [vmem:[#allocation10 + $0x70] sm:$0xff]  ;;  %v354_v50 = vld [vmem:[#allocation10 + $0x68] sm:$0xff]  ;;  %s604_s3 = smov [#allocation13]  }
  0x1c   :  { %198 = vmatpush.msra.mxu3 %v674_v5  ;;  %219 = vmatpush.msrb.mxu0 %v663_v0  ;;  %v356_v48 = vld [vmem:[#allocation10 + $0x78] sm:$0xff]  ;;  %v353_v51 = vld [vmem:[#allocation10 + $0x60] sm:$0xff]  ;;  %v351_v53 = vld [vmem:[#allocation10 + $0x50] sm:$0xff]  ;;  %s398_s26 = sshll.u32 %s604_s3, 4  ;;  %s399_s26 = int_to_ptr.vmem [resolvable:$true] %s398_s26 }
  0x1d   :  { %151 = vmatpush.msra.mxu1 %v679_v7  ;;  %175 = vmatpush.msra.mxu2 %v679_v7  ;;  %v352_v52 = vld [vmem:[#allocation10 + $0x58] sm:$0xff]  ;;  %v350_v54 = vld [vmem:[#allocation10 + $0x48] sm:$0xff]  ;;  %v349_v59 = vld [vmem:[#allocation10 + $0x40] sm:$0xff] }
  0x1e   :  { %199 = vmatpush.msra.mxu3 %v679_v7  ;;  %220 = vmatpush.msrb.mxu0 %v665_v1  ;;  %v348_v60 = vld [vmem:[#allocation10 + $0x38] sm:$0xff]  ;;  %v347_v61 = vld [vmem:[#allocation10 + $0x30] sm:$0xff]  ;;  %v346_v62 = vld [vmem:[#allocation10 + $0x28] sm:$0xff] }
  0x1f   :  { %152 = vmatpush.msra.mxu1 %v686_v9  ;;  %176 = vmatpush.msra.mxu2 %v686_v9  ;;  %v145_v20 = vld [vmem:[#allocation2] sm:$0x1]  ;;  %v345_v63 = vld [vmem:[#allocation10 + $0x20] sm:$0xff] }
  0x20   :  { %200 = vmatpush.msra.mxu3 %v686_v9  ;;  %221 = vmatpush.msrb.mxu0 %v669_v2  ;;  %v341_v3 = vld [vmem:[#allocation10] sm:$0xff] }
  0x21   :  { %153 = vmatpush.msra.mxu1 %v692_v10  ;;  %177 = vmatpush.msra.mxu2 %v692_v10 }
  0x22   :  { %201 = vmatpush.msra.mxu3 %v692_v10  ;;  %222 = vmatpush.msrb.mxu0 %v674_v5 }
  0x23   :  { %154 = vmatpush.msra.mxu1 %v698_v11  ;;  %178 = vmatpush.msra.mxu2 %v698_v11 }
  0x24   :  { %202 = vmatpush.msra.mxu3 %v698_v11  ;;  %223 = vmatpush.msrb.mxu0 %v679_v7 }
  0x25   :  { %155 = vmatpush.msra.mxu1 %v704_v12  ;;  %179 = vmatpush.msra.mxu2 %v704_v12 }
  0x26   :  { %203 = vmatpush.msra.mxu3 %v704_v12  ;;  %224 = vmatpush.msrb.mxu0 %v686_v9 }
  0x27   :  { %156 = vmatpush.msra.mxu1 %v710_v13  ;;  %180 = vmatpush.msra.mxu2 %v710_v13 }
  0x28   :  { %204 = vmatpush.msra.mxu3 %v710_v13  ;;  %225 = vmatpush.msrb.mxu0 %v692_v10 }
  0x29   :  { %157 = vmatpush.msra.mxu1 %v716_v14  ;;  %181 = vmatpush.msra.mxu2 %v716_v14 }
  0x2a   :  { %205 = vmatpush.msra.mxu3 %v716_v14  ;;  %226 = vmatpush.msrb.mxu0 %v698_v11 }
  0x2b   :  { %158 = vmatpush.msra.mxu1 %v722_v15  ;;  %182 = vmatpush.msra.mxu2 %v722_v15 }
  0x2c   :  { %206 = vmatpush.msra.mxu3 %v722_v15  ;;  %227 = vmatpush.msrb.mxu0 %v704_v12 }
  0x2d   :  { %159 = vmatpush.msra.mxu1 %v728_v16  ;;  %183 = vmatpush.msra.mxu2 %v728_v16 }
  0x2e   :  { %207 = vmatpush.msra.mxu3 %v728_v16  ;;  %228 = vmatpush.msrb.mxu0 %v710_v13 }
  0x2f   :  { %160 = vmatpush.msra.mxu1 %v734_v17  ;;  %184 = vmatpush.msra.mxu2 %v734_v17 }
  0x30   :  { %208 = vmatpush.msra.mxu3 %v734_v17  ;;  %229 = vmatpush.msrb.mxu0 %v716_v14 }
  0x31   :  { %161 = vmatpush.msra.mxu1 %v740_v18  ;;  %185 = vmatpush.msra.mxu2 %v740_v18 }
  0x32   :  { %209 = vmatpush.msra.mxu3 %v740_v18  ;;  %230 = vmatpush.msrb.mxu0 %v722_v15 }
  0x33   :  { %162 = vmatpush.msra.mxu1 %v746_v19  ;;  %186 = vmatpush.msra.mxu2 %v746_v19 }
  0x34   :  { %163 = vmatmul.f32.vlgmr.msra.gmra.mxu1 %v145_v20  ;;  %210 = vmatpush.msra.mxu3 %v746_v19 }
  0x35   :  { %231 = vmatpush.msrb.mxu0 %v728_v16  ;;  %243 = vmatpush.msrb.mxu1 %v663_v0 }
  0x36   :  { %267 = vmatpush.msrb.mxu2 %v663_v0  ;;  %291 = vmatpush.msrb.mxu3 %v663_v0 }
  0x37   :  { %232 = vmatpush.msrb.mxu0 %v734_v17  ;;  %244 = vmatpush.msrb.mxu1 %v665_v1 }
  0x38   :  { %268 = vmatpush.msrb.mxu2 %v665_v1  ;;  %292 = vmatpush.msrb.mxu3 %v665_v1 }
  0x39   :  { %233 = vmatpush.msrb.mxu0 %v740_v18  ;;  %245 = vmatpush.msrb.mxu1 %v669_v2 }
  0x3a   :  { %269 = vmatpush.msrb.mxu2 %v669_v2  ;;  %293 = vmatpush.msrb.mxu3 %v669_v2 }
  0x3b   :  { %234 = vmatpush.msrb.mxu0 %v746_v19  ;;  %246 = vmatpush.msrb.mxu1 %v674_v5 }
  0x3c   :  { %270 = vmatpush.msrb.mxu2 %v674_v5  ;;  %294 = vmatpush.msrb.mxu3 %v674_v5 }
  0x3d   :  { %315 = vmatpush.msra.mxu0 %v663_v0  ;;  %247 = vmatpush.msrb.mxu1 %v679_v7  ;;  %v344_v0 = vld [vmem:[#allocation10 + $0x18] sm:$0xff] }
  0x3e   :  { %271 = vmatpush.msrb.mxu2 %v679_v7  ;;  %295 = vmatpush.msrb.mxu3 %v679_v7 }
  0x3f   :  { %316 = vmatpush.msra.mxu0 %v665_v1  ;;  %248 = vmatpush.msrb.mxu1 %v686_v9  ;;  %v343_v1 = vld [vmem:[#allocation10 + $0x10] sm:$0xff] }
  0x40   :  { %272 = vmatpush.msrb.mxu2 %v686_v9  ;;  %296 = vmatpush.msrb.mxu3 %v686_v9 }
  0x41   :  { %317 = vmatpush.msra.mxu0 %v669_v2  ;;  %249 = vmatpush.msrb.mxu1 %v692_v10  ;;  %v342_v2 = vld [vmem:[#allocation10 + $0x8] sm:$0xff] }
  0x42   :  { %273 = vmatpush.msrb.mxu2 %v692_v10  ;;  %297 = vmatpush.msrb.mxu3 %v692_v10 }
  0x43   :  { %318 = vmatpush.msra.mxu0 %v674_v5  ;;  %250 = vmatpush.msrb.mxu1 %v698_v11 }
  0x44   :  { %274 = vmatpush.msrb.mxu2 %v698_v11  ;;  %298 = vmatpush.msrb.mxu3 %v698_v11 }
  0x45   :  { %319 = vmatpush.msra.mxu0 %v679_v7  ;;  %251 = vmatpush.msrb.mxu1 %v704_v12 }
  0x46   :  { %275 = vmatpush.msrb.mxu2 %v704_v12  ;;  %299 = vmatpush.msrb.mxu3 %v704_v12 }
  0x47   :  { %320 = vmatpush.msra.mxu0 %v686_v9  ;;  %252 = vmatpush.msrb.mxu1 %v710_v13  ;;  %v427_v9 = vld [vmem:[%s843_s5] ss:$0 sm:$0xff] }
  0x48   :  { %276 = vmatpush.msrb.mxu2 %v710_v13  ;;  %300 = vmatpush.msrb.mxu3 %v710_v13 }
  0x49   :  { %321 = vmatpush.msra.mxu0 %v692_v10  ;;  %253 = vmatpush.msrb.mxu1 %v716_v14 }
  0x4a   :  { %277 = vmatpush.msrb.mxu2 %v716_v14  ;;  %301 = vmatpush.msrb.mxu3 %v716_v14 }
  0x4b   :  { %322 = vmatpush.msra.mxu0 %v698_v11  ;;  %254 = vmatpush.msrb.mxu1 %v722_v15 }
  0x4c   :  { %278 = vmatpush.msrb.mxu2 %v722_v15  ;;  %302 = vmatpush.msrb.mxu3 %v722_v15 }
  0x4d   :  { %323 = vmatpush.msra.mxu0 %v704_v12  ;;  %255 = vmatpush.msrb.mxu1 %v728_v16 }
  0x4e   :  { %279 = vmatpush.msrb.mxu2 %v728_v16  ;;  %303 = vmatpush.msrb.mxu3 %v728_v16 }
  0x4f   :  { %324 = vmatpush.msra.mxu0 %v710_v13  ;;  %256 = vmatpush.msrb.mxu1 %v734_v17 }
  0x50   :  { %280 = vmatpush.msrb.mxu2 %v734_v17  ;;  %304 = vmatpush.msrb.mxu3 %v734_v17 }
  0x51   :  { %325 = vmatpush.msra.mxu0 %v716_v14  ;;  %257 = vmatpush.msrb.mxu1 %v740_v18 }
  0x52   :  { %281 = vmatpush.msrb.mxu2 %v740_v18  ;;  %305 = vmatpush.msrb.mxu3 %v740_v18 }
  0x53   :  { %326 = vmatpush.msra.mxu0 %v722_v15  ;;  %258 = vmatpush.msrb.mxu1 %v746_v19 }
  0x54   :  { %282 = vmatpush.msrb.mxu2 %v746_v19  ;;  %306 = vmatpush.msrb.mxu3 %v746_v19 }
  0x55   :  { %327 = vmatpush.msra.mxu0 %v728_v16  ;;  %361 = vmatpush.msra.mxu1 %v356_v48 }
  0x57   :  { %328 = vmatpush.msra.mxu0 %v734_v17  ;;  %362 = vmatpush.msra.mxu1 %v355_v49 }
  0x59   :  { %329 = vmatpush.msra.mxu0 %v740_v18  ;;  %363 = vmatpush.msra.mxu1 %v354_v50 }
  0x5b   :  { %330 = vmatpush.msra.mxu0 %v746_v19  ;;  %364 = vmatpush.msra.mxu1 %v353_v51 }
  0x5d   :  { %365 = vmatpush.msra.mxu1 %v352_v52 }
  0x5f   :  { %366 = vmatpush.msra.mxu1 %v351_v53 }
  0x61   :  { %367 = vmatpush.msra.mxu1 %v350_v54 }
  0x63   :  { %368 = vmatpush.msra.mxu1 %v349_v59 }
  0x65   :  { %369 = vmatpush.msra.mxu1 %v348_v60 }
  0x67   :  { %370 = vmatpush.msra.mxu1 %v347_v61 }
  0x69   :  { %371 = vmatpush.msra.mxu1 %v346_v62 }
  0x6b   :  { %372 = vmatpush.msra.mxu1 %v345_v63 }
  0x6d   :  { %373 = vmatpush.msra.mxu1 %v344_v0 }
  0x6f   :  { %374 = vmatpush.msra.mxu1 %v343_v1 }
  0x71   :  { %375 = vmatpush.msra.mxu1 %v342_v2 }
  0x73   :  { %376 = vmatpush.msra.mxu1 %v341_v3 }
  0x97   :  { %v125_v22 = vpop.f32.mrf.mxu0 }
  0x98   :  { %v126_v23 = vadd.f32 %v426_v21, %v125_v22 }
  0x9a   :  { %128 = vst [vmem:[#allocation3] sm:$0xff] %v126_v23 }
  0xa1   :  { %v146_v24 = vld [vmem:[#allocation3] sm:$0x1]  ;;  %v170_v28 = vld [vmem:[#allocation3 + $0x1] sm:$0x1]  ;;  %v194_v32 = vld [vmem:[#allocation3 + $0x2] sm:$0x1] }
  0xa2   :  { %v218_v36 = vld [vmem:[#allocation3 + $0x3] sm:$0x1]  ;;  %v242_v40 = vld [vmem:[#allocation3 + $0x4] sm:$0x1]  ;;  %v266_v44 = vld [vmem:[#allocation3 + $0x5] sm:$0x1] }
  0xa3   :  { %v290_v55 = vld [vmem:[#allocation3 + $0x6] sm:$0x1]  ;;  %v314_v4 = vld [vmem:[#allocation3 + $0x7] sm:$0x1] }
  0xb1   :  { %v164_v25 = vpop.f32.mrf.mxu1 }
  0xb2   :  { %v167_v26 = vadd.f32 %v164_v25, %v146_v24 }
  0xb4   :  { %428 = vtanh.f32 %v167_v26 }
  0xba   :  { %v429_v27 = vpop.eup %428 }
  0xbb   :  { %169 = vst [vmem:[#allocation3] sm:$0x1] %v429_v27  ;;  %187 = vmatmul.f32.vlgmr.msra.gmra.mxu2 %v429_v27 }
 0x13e   :  { %v188_v29 = vpop.f32.mrf.mxu2 }
 0x13f   :  { %v191_v30 = vadd.f32 %v188_v29, %v170_v28 }
 0x141   :  { %430 = vtanh.f32 %v191_v30 }
 0x147   :  { %v431_v31 = vpop.eup %430 }
 0x148   :  { %193 = vst [vmem:[#allocation3 + $0x1] sm:$0x1] %v431_v31  ;;  %211 = vmatmul.f32.vlgmr.msra.gmra.mxu3 %v431_v31 }
 0x1cb   :  { %v212_v33 = vpop.f32.mrf.mxu3 }
 0x1cc   :  { %v215_v34 = vadd.f32 %v212_v33, %v194_v32 }
 0x1ce   :  { %432 = vtanh.f32 %v215_v34 }
 0x1d4   :  { %v433_v35 = vpop.eup %432 }
 0x1d5   :  { %217 = vst [vmem:[#allocation3 + $0x2] sm:$0x1] %v433_v35  ;;  %235 = vmatmul.f32.vlgmr.msrb.gmra.mxu0 %v433_v35 }
 0x252   :  { %v236_v37 = vpop.f32.mrf.mxu0 }
 0x253   :  { %v239_v38 = vadd.f32 %v236_v37, %v218_v36 }
 0x255   :  { %434 = vtanh.f32 %v239_v38 }
 0x25b   :  { %v435_v39 = vpop.eup %434 }
 0x25c   :  { %241 = vst [vmem:[#allocation3 + $0x3] sm:$0x1] %v435_v39  ;;  %259 = vmatmul.f32.vlgmr.msrb.gmra.mxu1 %v435_v39 }
 0x2d9   :  { %v260_v41 = vpop.f32.mrf.mxu1 }
 0x2da   :  { %v263_v42 = vadd.f32 %v260_v41, %v242_v40 }
 0x2dc   :  { %436 = vtanh.f32 %v263_v42 }
 0x2e2   :  { %v437_v43 = vpop.eup %436 }
 0x2e3   :  { %265 = vst [vmem:[#allocation3 + $0x4] sm:$0x1] %v437_v43  ;;  %283 = vmatmul.f32.vlgmr.msrb.gmra.mxu2 %v437_v43 }
 0x366   :  { %v284_v45 = vpop.f32.mrf.mxu2 }
 0x367   :  { %v287_v46 = vadd.f32 %v284_v45, %v266_v44 }
 0x369   :  { %438 = vtanh.f32 %v287_v46 }
 0x36f   :  { %v439_v47 = vpop.eup %438 }
 0x370   :  { %289 = vst [vmem:[#allocation3 + $0x5] sm:$0x1] %v439_v47  ;;  %307 = vmatmul.f32.vlgmr.msrb.gmra.mxu3 %v439_v47 }
 0x3f3   :  { %v308_v56 = vpop.f32.mrf.mxu3 }
 0x3f4   :  { %v311_v57 = vadd.f32 %v308_v56, %v290_v55 }
 0x3f6   :  { %440 = vtanh.f32 %v311_v57 }
 0x3fc   :  { %v441_v58 = vpop.eup %440 }
 0x3fd   :  { %313 = vst [vmem:[#allocation3 + $0x6] sm:$0x1] %v441_v58  ;;  %331 = vmatmul.f32.vlgmr.msra.gmra.mxu0 %v441_v58 }
 0x47a   :  { %v332_v5 = vpop.f32.mrf.mxu0 }
 0x47b   :  { %v335_v6 = vadd.f32 %v332_v5, %v314_v4 }
 0x47d   :  { %442 = vtanh.f32 %v335_v6 }
 0x483   :  { %v443_v7 = vpop.eup %442 }
 0x484   :  { %337 = vst [vmem:[#allocation3 + $0x7] sm:$0x1] %v443_v7 }
 0x485   :  { %338 = vst [vmem:[#allocation2] sm:$0x1] %v443_v7 }
 0x486   :  { %339 = vst [vmem:[#allocation13] sm:$0x1] %v443_v7 }
 0x487   :  { %403 = dma.vmem_to_hbm [thread:$0]  %s399_s26, 16, %s401_s29, [#allocation14]  }
 0x48b   :  { %v340_v8 = vld [vmem:[#allocation3] sm:$0xff] }
 0x48c   :  { %377 = vmatmul.f32.vlgmr.msra.gmra.mxu1 %v340_v8 }
 0x509   :  { %v378_v10 = vpop.f32.mrf.mxu1 }
 0x50a   :  { %v379_v11 = vadd.f32 %v427_v9, %v378_v10 }
 0x50c   :  { %381 = vst [vmem:[#allocation12] sm:$0xff] %v379_v11 }
 0x50d   :  { %392 = dma.vmem_to_hbm [thread:$0]  %s388_s11, 128, %s390_s14, [#allocation6]  }
 0x50e   :  { %594 = dma.done.wait [#allocation6], 128  }
 0x50f   :  { %595 = vsyncadd [#allocation6], 4294967168 }
 0x510   :  { %596 = dma.done.wait [#allocation14], 16  }
 0x511   :  { %597 = vsyncadd [#allocation14], 4294967280 }
 0x512   :  { %412 = vsyncpa [#allocation5], 1 }
 0x513   :  { %413 = vsyncpa [#allocation8], 1 }
 0x514   :  { %414 = vsyncpa [#allocation11], 1 }
 0x515   :  { %415 = vsyncpa [#allocation6], 1 }
 0x516   :  { %416 = vsyncpa [#allocation14], 1 }

</bundles_post_ra>
